<compile_context>
chip_gen: v6e
topology: v6e:2x2x1
jax: 0.10.0
libtpu: 0.0.40
codegen_flags: <defaults>
</compile_context>

<pallas_src>
import functools
import math

import jax
import jax.numpy as jnp
import numpy as np
from jax.experimental import pallas as pl
from jax.experimental.pallas import tpu as pltpu


def _round_up(v, m):
    return (v + m - 1) // m * m


def _gcn_kernel(a_ref, x_ref, wt_ref, b_ref, o_ref, acc_ref):
    """One (row-tile i, k-tile) grid step.

    a_ref   : (TM, TK)     bf16 tile of the (dense) adjacency / support matrix
    x_ref   : (Npad, F)    bf16 node features, fully resident in VMEM
    wt_ref  : (2F, H)      f32  Linear weight, pre-transposed ([W1.T ; W2.T])
    b_ref   : (1, H)       f32  bias
    o_ref   : (TM, H)      output tile (written on the last k step)
    acc_ref : (TM, F)      f32  VMEM accumulator for (support @ x)
    """
    i = pl.program_id(0)
    k = pl.program_id(1)
    tm, f = acc_ref.shape
    tk = a_ref.shape[1]

    @pl.when(k == 0)
    def _():
        acc_ref[...] = jnp.zeros_like(acc_ref)

    # Hot path: adjacency @ features, reduced over the k grid axis.
    xk = x_ref[pl.ds(pl.multiple_of(k * tk, tk), tk), :]
    acc_ref[...] += jnp.dot(a_ref[...], xk, preferred_element_type=jnp.float32)

    @pl.when(k == pl.num_programs(1) - 1)
    def _():
        # Epilogue (once per row tile): fused "concat + Linear + bias + ReLU".
        # [A@x | x] @ W.T  ==  (A@x) @ W.T[:F] + x @ W.T[F:]
        xi = x_ref[pl.ds(pl.multiple_of(i * tm, tm), tm), :].astype(jnp.float32)
        out = jnp.dot(acc_ref[...], wt_ref[:f, :],
                      preferred_element_type=jnp.float32)
        out += jnp.dot(xi, wt_ref[f:, :], preferred_element_type=jnp.float32)
        out += b_ref[...].astype(jnp.float32)
        o_ref[...] = jnp.maximum(out, 0.0).astype(o_ref.dtype)


@functools.partial(jax.jit, static_argnames=("tm", "tk"))
def graph_convolution(support, x, weight, bias, *, tm=256, tk=256):
    """Pallas GCN layer: relu(concat([support @ x, x], 1) @ weight.T + bias)."""
    n, f = x.shape
    h = weight.shape[0]
    assert support.shape == (n, n)
    assert weight.shape == (h, 2 * f)
    assert tm % 8 == 0 and tk % 128 == 0, "tile sizes must respect (8,128) tiling"

    out_dtype = x.dtype

    # Host-side zero padding so the tiles divide N (zero rows/cols of the
    # adjacency and zero feature rows do not change the valid output rows).
    n_pad = _round_up(n, math.lcm(tm, tk))
    if n_pad != n:
        support = jnp.pad(support, ((0, n_pad - n), (0, n_pad - n)))
        x = jnp.pad(x, ((0, n_pad - n), (0, 0)))

    # bf16 inputs for the HBM-bound adjacency read + native MXU dtype.
    # Accumulation stays f32 inside the kernel.
    support_c = support.astype(jnp.bfloat16)
    x_c = x.astype(jnp.bfloat16)

    # Pre-transposed Linear weight (2F, H) and 2-D bias (glue, plain JAX).
    wt = weight.T.astype(jnp.float32)          # (2F, H) == [W1.T ; W2.T]
    b2d = bias.reshape(1, h).astype(jnp.float32)

    grid = (n_pad // tm, n_pad // tk)

    out_padded = pl.pallas_call(
        _gcn_kernel,
        out_shape=jax.ShapeDtypeStruct((n_pad, h), out_dtype),
        grid_spec=pltpu.PrefetchScalarGridSpec(
            num_scalar_prefetch=0,
            grid=grid,
            in_specs=[
                pl.BlockSpec((tm, tk), lambda i, k: (i, k)),    # adjacency tile
                pl.BlockSpec((n_pad, f), lambda i, k: (0, 0)),  # x fully resident
                pl.BlockSpec((2 * f, h), lambda i, k: (0, 0)),  # W.T resident
                pl.BlockSpec((1, h), lambda i, k: (0, 0)),      # bias resident
            ],
            out_specs=pl.BlockSpec((tm, h), lambda i, k: (i, 0)),
            scratch_shapes=[pltpu.VMEM((tm, f), jnp.float32)],
        ),
        compiler_params=pltpu.CompilerParams(
            # row-tile axis parallel (megacore / v7x 2-TC sharding);
            # k axis is the reduction -> arbitrary.
            dimension_semantics=("parallel", "arbitrary"),
            # Explicit scoped-VMEM budget: our footprint (double-buffered bf16
            # adjacency tiles + resident x/W + f32 acc) is < 2 MiB even at
            # 512x512 tiles, so 32 MiB is safe on v5e/v6e (128 MiB physical)
            # and on v7x (64 MiB physical).
            vmem_limit_bytes=32 * 1024 * 1024,
        ),
    )(support_c, x_c, wt, b2d)

    return out_padded[:n]


def _reference(support, x, weight, bias):
    s = jnp.dot(support, x, precision=jax.lax.Precision.HIGHEST)
    s = jnp.concatenate([s, x], axis=1)
    out = jnp.dot(s, weight.T, precision=jax.lax.Precision.HIGHEST) + bias
    return jax.nn.relu(out)


if __name__ == "__main__":
    # Module config: input_dim = 2*F (because of the concat), output_dim = H.
    N, F, H = 256, 32, 64

    key = jax.random.PRNGKey(0)
    k_sup, k_x, k_w, k_b = jax.random.split(key, 4)

    # Dense stand-in for the (normally sparse) normalized adjacency.
    support = jax.random.uniform(k_sup, (N, N), jnp.float32) / N
    x = jax.random.normal(k_x, (N, F), jnp.float32)

    # Deterministic nn.Linear(2F, H) init (uniform(-1/sqrt(fan_in), 1/sqrt(fan_in))).
    bound = 1.0 / np.sqrt(2 * F)
    weight = jax.random.uniform(k_w, (H, 2 * F), jnp.float32, -bound, bound)
    bias = jax.random.uniform(k_b, (H,), jnp.float32, -bound, bound)

    out = graph_convolution(support, x, weight, bias)
    out = jax.block_until_ready(out)

    # Tight check against a reference computed on the same bf16-rounded inputs
    # (isolates tiling/accumulation-order differences).
    sup_r = support.astype(jnp.bfloat16).astype(jnp.float32)
    x_r = x.astype(jnp.bfloat16).astype(jnp.float32)
    ref_bf16_inputs = _reference(sup_r, x_r, weight, bias)
    np.testing.assert_allclose(
        np.asarray(out), np.asarray(ref_bf16_inputs), rtol=1e-3, atol=1e-3
    )

    # Loose sanity check against the full-precision f32 reference
    # (covers the bf16 input-rounding error).
    ref_f32 = _reference(support, x, weight, bias)
    np.testing.assert_allclose(
        np.asarray(out), np.asarray(ref_f32), rtol=5e-2, atol=1e-2
    )

    print("KERNEL_OK")
</pallas_src>

<mosaic_0001>
module attributes {stable_mosaic.version = 11 : i64} {
  func.func @_gcn_kernel(%arg0: i32, %arg1: i32, %arg2: memref<256x256xbf16, #tpu.memory_space<vmem>>, %arg3: memref<256x32xbf16, #tpu.memory_space<vmem>>, %arg4: memref<64x64xf32, #tpu.memory_space<vmem>>, %arg5: memref<1x64xf32, #tpu.memory_space<vmem>>, %arg6: memref<256x64xf32, #tpu.memory_space<vmem>>, %arg7: memref<256x32xf32, #tpu.memory_space<vmem>>) attributes {dimension_semantics = [#tpu.dimension_semantics<parallel>, #tpu.dimension_semantics<arbitrary>], iteration_bounds = array<i64: 1, 1>, scalar_prefetch = 0 : i64, scratch_operands = 1 : i64, tpu.core_type = #tpu.core_type<tc>, window_params = [{transform_indices = @transform_0, window_bounds = array<i64: 256, 256>}, {pipeline_mode = #tpu.pipeline_mode<synchronous>, transform_indices = @transform_1, window_bounds = array<i64: 256, 32>}, {pipeline_mode = #tpu.pipeline_mode<synchronous>, transform_indices = @transform_2, window_bounds = array<i64: 64, 64>}, {pipeline_mode = #tpu.pipeline_mode<synchronous>, transform_indices = @transform_3, window_bounds = array<i64: 1, 64>}, {transform_indices = @transform_4, window_bounds = array<i64: 256, 64>}]} {
    %c0_i32 = arith.constant 0 : i32
    %0 = arith.cmpi eq, %arg1, %c0_i32 : i32
    %1 = arith.extui %0 : i1 to i32
    %c0_i32_0 = arith.constant 0 : i32
    %2 = arith.cmpi ne, %1, %c0_i32_0 : i32
    scf.if %2 {
      %cst_9 = arith.constant 0.000000e+00 : f32
      %15 = vector.broadcast %cst_9 : f32 to vector<256x32xf32>
      %c0_10 = arith.constant 0 : index
      %c0_11 = arith.constant 0 : index
      %16 = vector.load %arg7[%c0_10, %c0_11] : memref<256x32xf32, #tpu.memory_space<vmem>>, vector<256x32xf32>
      tpu.vector_store %arg7[%c0_10, %c0_11], %15 {strides = array<i32>} : memref<256x32xf32, #tpu.memory_space<vmem>>, vector<256x32xf32>,
    } else {
    }
    %c256_i32 = arith.constant 256 : i32
    %3 = arith.muli %arg1, %c256_i32 : i32
    %4 = tpu.assume_multiple %3, 256 : i32
    %5 = arith.index_cast %4 : i32 to index
    %c0 = arith.constant 0 : index
    %6 = vector.load %arg3[%5, %c0] : memref<256x32xbf16, #tpu.memory_space<vmem>>, vector<256x32xbf16>
    %c0_1 = arith.constant 0 : index
    %c0_2 = arith.constant 0 : index
    %7 = vector.load %arg7[%c0_1, %c0_2] : memref<256x32xf32, #tpu.memory_space<vmem>>, vector<256x32xf32>
    %c0_3 = arith.constant 0 : index
    %c0_4 = arith.constant 0 : index
    %8 = vector.load %arg2[%c0_3, %c0_4] : memref<256x256xbf16, #tpu.memory_space<vmem>>, vector<256x256xbf16>
    %cst = arith.constant dense<0.000000e+00> : vector<256x32xf32>
    %9 = tpu.matmul %8, %6, %cst {dimension_numbers = #tpu.dot_dimension_numbers<[1], [0], [0], [1], [0, 0, 1, 1], [], []>} : vector<256x256xbf16>, vector<256x32xbf16>, vector<256x32xf32> -> vector<256x32xf32>
    %10 = arith.addf %7, %9 : vector<256x32xf32>
    %c0_5 = arith.constant 0 : index
    %c0_6 = arith.constant 0 : index
    %11 = vector.load %arg7[%c0_5, %c0_6] : memref<256x32xf32, #tpu.memory_space<vmem>>, vector<256x32xf32>
    tpu.vector_store %arg7[%c0_5, %c0_6], %10 {strides = array<i32>} : memref<256x32xf32, #tpu.memory_space<vmem>>, vector<256x32xf32>,
    %c0_i32_7 = arith.constant 0 : i32
    %12 = arith.cmpi eq, %arg1, %c0_i32_7 : i32
    %13 = arith.extui %12 : i1 to i32
    %c0_i32_8 = arith.constant 0 : i32
    %14 = arith.cmpi ne, %13, %c0_i32_8 : i32
    scf.if %14 {
      %c256_i32_9 = arith.constant 256 : i32
      %15 = arith.muli %arg0, %c256_i32_9 : i32
      %16 = tpu.assume_multiple %15, 256 : i32
      %17 = arith.index_cast %16 : i32 to index
      %c0_10 = arith.constant 0 : index
      %18 = vector.load %arg3[%17, %c0_10] : memref<256x32xbf16, #tpu.memory_space<vmem>>, vector<256x32xbf16>
      %19 = arith.extf %18 : vector<256x32xbf16> to vector<256x32xf32>
      %c0_11 = arith.constant 0 : index
      %c0_12 = arith.constant 0 : index
      %20 = vector.load %arg7[%c0_11, %c0_12] : memref<256x32xf32, #tpu.memory_space<vmem>>, vector<256x32xf32>
      %c0_13 = arith.constant 0 : index
      %c0_14 = arith.constant 0 : index
      %21 = vector.load %arg4[%c0_13, %c0_14] : memref<64x64xf32, #tpu.memory_space<vmem>>, vector<32x64xf32>
      %cst_15 = arith.constant dense<0.000000e+00> : vector<256x64xf32>
      %22 = tpu.matmul %20, %21, %cst_15 {dimension_numbers = #tpu.dot_dimension_numbers<[1], [0], [0], [1], [0, 0, 1, 1], [], []>} : vector<256x32xf32>, vector<32x64xf32>, vector<256x64xf32> -> vector<256x64xf32>
      %c32 = arith.constant 32 : index
      %c0_16 = arith.constant 0 : index
      %23 = vector.load %arg4[%c32, %c0_16] : memref<64x64xf32, #tpu.memory_space<vmem>>, vector<32x64xf32>
      %cst_17 = arith.constant dense<0.000000e+00> : vector<256x64xf32>
      %24 = tpu.matmul %19, %23, %cst_17 {dimension_numbers = #tpu.dot_dimension_numbers<[1], [0], [0], [1], [0, 0, 1, 1], [], []>} : vector<256x32xf32>, vector<32x64xf32>, vector<256x64xf32> -> vector<256x64xf32>
      %25 = arith.addf %22, %24 : vector<256x64xf32>
      %c0_18 = arith.constant 0 : index
      %c0_19 = arith.constant 0 : index
      %26 = vector.load %arg5[%c0_18, %c0_19] : memref<1x64xf32, #tpu.memory_space<vmem>>, vector<1x64xf32>
      %27 = vector.broadcast %26 : vector<1x64xf32> to vector<256x64xf32>
      %28 = arith.addf %25, %27 : vector<256x64xf32>
      %cst_20 = arith.constant 0.000000e+00 : f32
      %29 = vector.broadcast %cst_20 : f32 to vector<256x64xf32>
      %30 = arith.maximumf %28, %29 : vector<256x64xf32>
      %c0_21 = arith.constant 0 : index
      %c0_22 = arith.constant 0 : index
      %31 = vector.load %arg6[%c0_21, %c0_22] : memref<256x64xf32, #tpu.memory_space<vmem>>, vector<256x64xf32>
      tpu.vector_store %arg6[%c0_21, %c0_22], %30 {strides = array<i32>} : memref<256x64xf32, #tpu.memory_space<vmem>>, vector<256x64xf32>,
    } else {
    }
    return
  }
  func.func @transform_0(%arg0: i32, %arg1: i32) -> (i32, i32) {
    %c0_i32 = arith.constant 0 : i32
    return %arg0, %arg1 : i32, i32
  }
  func.func @transform_1(%arg0: i32, %arg1: i32) -> (i32, i32) {
    %c0_i32 = arith.constant 0 : i32
    %c0_i32_0 = arith.constant 0 : i32
    %c0_i32_1 = arith.constant 0 : i32
    return %c0_i32, %c0_i32_0 : i32, i32
  }
  func.func @transform_2(%arg0: i32, %arg1: i32) -> (i32, i32) {
    %c0_i32 = arith.constant 0 : i32
    %c0_i32_0 = arith.constant 0 : i32
    %c0_i32_1 = arith.constant 0 : i32
    return %c0_i32, %c0_i32_0 : i32, i32
  }
  func.func @transform_3(%arg0: i32, %arg1: i32) -> (i32, i32) {
    %c0_i32 = arith.constant 0 : i32
    %c0_i32_0 = arith.constant 0 : i32
    %c0_i32_1 = arith.constant 0 : i32
    return %c0_i32, %c0_i32_0 : i32, i32
  }
  func.func @transform_4(%arg0: i32, %arg1: i32) -> (i32, i32) {
    %c0_i32 = arith.constant 0 : i32
    %c0_i32_0 = arith.constant 0 : i32
    return %arg0, %c0_i32 : i32, i32
  }
}

</mosaic_0001>

<bundles_post_ra>
// kernel: graph_convolution.1
= control target key start
LH: loop header
LB: loop body
LE: loop exit
PB: predicated region body
PF: predicated region fallthrough
CT: control target
= control target key end

     0   :  { %vm22_vm0 = vcmask 261120   ;;  %vm1463_vm1 = vcmask 523264   ;;  %s2688_s1 = inlined_call_operand.vmem [shape: bf16[256,32], index: 1, kind: input, shape index: {}]   ;;  %s2689_s0 = inlined_call_operand.vmem [shape: bf16[256,256], index: 0, kind: input, shape index: {}]   ;;  %s2690_s2 = inlined_call_operand.vmem [shape: f32[64,64], index: 2, kind: input, shape index: {}]   ;;  %s2691_s3 = inlined_call_operand.vmem [shape: f32[1,64], index: 3, kind: input, shape index: {}]   ;;  %s2692_s4 = inlined_call_operand.vmem [shape: f32[256,64], index: 4, kind: output, shape index: {}]  }
   0x1   :  { %v1993_v0 = vld [vmem:[%s2688_s1 + $0x78] sm:$0xff]   ;;  %v1995_v2 = vld [vmem:[%s2688_s1 + $0x70] sm:$0xff]   ;;  %v1997_v4 = vld [vmem:[%s2688_s1 + $0x68] sm:$0xff]  }
   0x2   :  { %v1994_v1 = vld [vmem:[%s2688_s1 + $0x38] sm:$0xff]   ;;  %1696 = vmatprep.subr.bf16.mxu0 %v1993_v0  ;;  %v1996_v3 = vld [vmem:[%s2688_s1 + $0x30] sm:$0xff]   ;;  %v1998_v5 = vld [vmem:[%s2688_s1 + $0x28] sm:$0xff]  }
   0x3   :  { %1697 = vmatpush3.bf16.msra.mxu0 %v1994_v1  ;;  %v1999_v6 = vld [vmem:[%s2688_s1 + $0x60] sm:$0xff]   ;;  %v2001_v8 = vld [vmem:[%s2688_s1 + $0x58] sm:$0xff]   ;;  %v2003_v10 = vld [vmem:[%s2688_s1 + $0x50] sm:$0xff]  }
   0x4   :  { %1698 = vmatprep.subr.bf16.mxu0 %v1995_v2  ;;  %v2000_v7 = vld [vmem:[%s2688_s1 + $0x20] sm:$0xff]   ;;  %v2002_v9 = vld [vmem:[%s2688_s1 + $0x18] sm:$0xff]   ;;  %v2004_v12 = vld [vmem:[%s2688_s1 + $0x10] sm:$0xff]  }
   0x5   :  { %v2011_v11 = vld [vmem:[%s2689_s0 + $0x4] ss:$8 sps:$4 sm:$0xff]   ;;  %v2009_v17 = vld [vmem:[%s2689_s0] ss:$8 sps:$4 sm:$0xff]   ;;  %v2012_v18 = vld [vmem:[%s2689_s0 + $0x14] ss:$8 sps:$4 sm:$0xff]  }
   0x6   :  { %444 = vmatprep.mubr.bf16.mxu0 %v2011_v11  ;;  %v2005_v13 = vld [vmem:[%s2688_s1 + $0x48] sm:$0xff]   ;;  %v2007_v15 = vld [vmem:[%s2688_s1 + $0x40] sm:$0xff]   ;;  %v749_v19 = vld [vmem:[%s2690_s2 + $0x38] sm:$0xff]  ;;  %v2057_v11 = vmov 0.0  }
   0x7   :  { %1699 = vmatpush3.bf16.msra.mxu0 %v1996_v3  ;;  %v2006_v14 = vld [vmem:[%s2688_s1 + $0x8] sm:$0xff]   ;;  %v2008_v16 = vld [vmem:[%s2688_s1] sm:$0xff]   ;;  %v748_v20 = vld [vmem:[%s2690_s2 + $0x30] sm:$0xff]  ;;  %1880 = vmatprep.subr.mxu1 %v749_v19  ;;  %23 = vst.msk [vmem:[#allocation2] sm:$0xff] %vm22_vm0, %v2057_v11 }
   0x8   :  { %1700 = vmatprep.subr.bf16.mxu0 %v1997_v4  ;;  %v2014_v21 = vld [vmem:[%s2689_s0 + $0x10] ss:$8 sps:$4 sm:$0xff]   ;;  %v1618_v22 = vld [vmem:[%s2688_s1] sm:$0xff]   ;;  %1881 = vmatpush3.msra.mxu1 %v749_v19  ;;  %v747_v24 = vld [vmem:[%s2690_s2 + $0x28] sm:$0xff]  ;;  %24 = vst.msk [vmem:[#allocation2 + $0x8] sm:$0xff] %vm22_vm0, %v2057_v11 }
   0x9   :  { %v2015_v23 = vld [vmem:[%s2689_s0 + $0x24] ss:$8 sps:$4 sm:$0xff]   ;;  %v1619_v25 = vunpack.c.l.bf16 %v1618_v22  ;;  %1882 = vmatprep.subr.mxu1 %v748_v20  ;;  %v1620_v28 = vunpack.c.h.bf16 %v1618_v22  ;;  %v1682_v30 = vld [vmem:[%s2688_s1 + $0x10] sm:$0xff]   ;;  %v2017_v31 = vld [vmem:[%s2689_s0 + $0x20] ss:$8 sps:$4 sm:$0xff]   ;;  %25 = vst.msk [vmem:[#allocation2 + $0x10] sm:$0xff] %vm22_vm0, %v2057_v11 }
   0xa   :  { %v1681_v26 = vld [vmem:[%s2688_s1 + $0x8] sm:$0xff]   ;;  %1883 = vmatpush3.msra.mxu1 %v748_v20  ;;  %v746_v27 = vld [vmem:[%s2690_s2 + $0x20] sm:$0xff]  ;;  %v2018_v33 = vld [vmem:[%s2689_s0 + $0x34] ss:$8 sps:$4 sm:$0xff]   ;;  %v1627_v34 = vunpack.c.l.bf16 %v1682_v30  ;;  %v1628_v36 = vunpack.c.h.bf16 %v1682_v30  ;;  %26 = vst.msk [vmem:[#allocation2 + $0x18] sm:$0xff] %vm22_vm0, %v2057_v11 }
   0xb   :  { %1701 = vmatpush3.bf16.msra.mxu0 %v1998_v5  ;;  %1888 = vmatprep.mubr.msk.f32.mxu1 %vm22_vm0, %v1619_v25  ;;  %v1623_v29 = vunpack.c.l.bf16 %v1681_v26  ;;  %v1624_v32 = vunpack.c.h.bf16 %v1681_v26  ;;  %v1683_v35 = vld [vmem:[%s2688_s1 + $0x18] sm:$0xff]   ;;  %v1684_v38 = vld [vmem:[%s2688_s1 + $0x20] sm:$0xff]   ;;  %v1685_v43 = vld [vmem:[%s2688_s1 + $0x28] sm:$0xff]   ;;  %27 = vst.msk [vmem:[#allocation2 + $0x20] sm:$0xff] %vm22_vm0, %v2057_v11 }
   0xc   :  { %1702 = vmatprep.subr.bf16.mxu0 %v1999_v6  ;;  %1884 = vmatprep.subr.mxu1 %v747_v24  ;;  %v1631_v37 = vunpack.c.l.bf16 %v1683_v35  ;;  %v2020_v39 = vld [vmem:[%s2689_s0 + $0x30] ss:$8 sps:$4 sm:$0xff]   ;;  %v1632_v40 = vunpack.c.h.bf16 %v1683_v35  ;;  %v2021_v41 = vld [vmem:[%s2689_s0 + $0x44] ss:$8 sps:$4 sm:$0xff]   ;;  %v1635_v42 = vunpack.c.l.bf16 %v1684_v38  ;;  %v1636_v44 = vunpack.c.h.bf16 %v1684_v38  ;;  %v2023_v47 = vld [vmem:[%s2689_s0 + $0x40] ss:$8 sps:$4 sm:$0xff]  }
   0xd   :  { %1885 = vmatpush3.msra.mxu1 %v747_v24  ;;  %v1639_v45 = vunpack.c.l.bf16 %v1685_v43  ;;  %v1686_v46 = vld [vmem:[%s2688_s1 + $0x30] sm:$0xff]   ;;  %v1640_v48 = vunpack.c.h.bf16 %v1685_v43  ;;  %v1687_v51 = vld [vmem:[%s2688_s1 + $0x38] sm:$0xff]   ;;  %v1688_v54 = vld [vmem:[%s2688_s1 + $0x40] sm:$0xff]   ;;  %28 = vst.msk [vmem:[#allocation2 + $0x28] sm:$0xff] %vm22_vm0, %v2057_v11 }
   0xe   :  { %1886 = vmatprep.subr.mxu1 %v746_v27  ;;  %v2024_v49 = vld [vmem:[%s2689_s0 + $0x54] ss:$8 sps:$4 sm:$0xff]   ;;  %v1643_v50 = vunpack.c.l.bf16 %v1686_v46  ;;  %v1644_v52 = vunpack.c.h.bf16 %v1686_v46  ;;  %v1647_v53 = vunpack.c.l.bf16 %v1687_v51  ;;  %v2026_v55 = vld [vmem:[%s2689_s0 + $0x50] ss:$8 sps:$4 sm:$0xff]   ;;  %v1648_v56 = vunpack.c.h.bf16 %v1687_v51  ;;  %v2027_v57 = vld [vmem:[%s2689_s0 + $0x64] ss:$8 sps:$4 sm:$0xff]  }
   0xf   :  { %1703 = vmatpush3.bf16.msra.mxu0 %v2000_v7  ;;  %1887 = vmatpush3.msra.mxu1 %v746_v27  ;;  %v1651_v58 = vunpack.c.l.bf16 %v1688_v54  ;;  %v1689_v59 = vld [vmem:[%s2688_s1 + $0x48] sm:$0xff]   ;;  %v1652_v60 = vunpack.c.h.bf16 %v1688_v54  ;;  %v1690_v62 = vld [vmem:[%s2688_s1 + $0x50] sm:$0xff]   ;;  %v1691_v3 = vld [vmem:[%s2688_s1 + $0x58] sm:$0xff]   ;;  %29 = vst.msk [vmem:[#allocation2 + $0x30] sm:$0xff] %vm22_vm0, %v2057_v11 }
  0x10   :  { %1704 = vmatprep.subr.bf16.mxu0 %v2001_v8  ;;  %1889 = vmatmul.mubr.msk.f32.vlgmr.msra.gmra.mxu1 %vm22_vm0, %v1620_v28  ;;  %v1655_v61 = vunpack.c.l.bf16 %v1689_v59  ;;  %v2029_v63 = vld [vmem:[%s2689_s0 + $0x60] ss:$8 sps:$4 sm:$0xff]   ;;  %v1656_v0 = vunpack.c.h.bf16 %v1689_v59  ;;  %v2030_v1 = vld [vmem:[%s2689_s0 + $0x74] ss:$8 sps:$4 sm:$0xff]   ;;  %v1659_v2 = vunpack.c.l.bf16 %v1690_v62  ;;  %v1660_v4 = vunpack.c.h.bf16 %v1690_v62  ;;  %v2032_v6 = vld [vmem:[%s2689_s0 + $0x70] ss:$8 sps:$4 sm:$0xff]  }
  0x11   :  { %1891 = vmatprep.mubr.msk.f32.mxu1 %vm22_vm0, %v1623_v29  ;;  %v1663_v5 = vunpack.c.l.bf16 %v1691_v3  ;;  %v1664_v7 = vunpack.c.h.bf16 %v1691_v3  ;;  %v2033_v8 = vld [vmem:[%s2689_s0 + $0x84] ss:$8 sps:$4 sm:$0xff]   ;;  %30 = vst.msk [vmem:[#allocation2 + $0x38] sm:$0xff] %vm22_vm0, %v2057_v11  ;;  %31 = vst.msk [vmem:[#allocation2 + $0x40] sm:$0xff] %vm22_vm0, %v2057_v11  ;;  %v1694_v20 = vld [vmem:[%s2688_s1 + $0x70] sm:$0xff]  }
  0x12   :  { %32 = vst.msk [vmem:[#allocation2 + $0x48] sm:$0xff] %vm22_vm0, %v2057_v11  ;;  %33 = vst.msk [vmem:[#allocation2 + $0x50] sm:$0xff] %vm22_vm0, %v2057_v11  ;;  %v2039_v19 = vld [vmem:[%s2689_s0 + $0xa4] ss:$8 sps:$4 sm:$0xff]   ;;  %v1676_v22 = vunpack.c.h.bf16 %v1694_v20  ;;  %v1695_v24 = vld [vmem:[%s2688_s1 + $0x78] sm:$0xff]  }
  0x13   :  { %1705 = vmatpush3.bf16.msra.mxu0 %v2002_v9  ;;  %v2035_v9 = vld [vmem:[%s2689_s0 + $0x80] ss:$8 sps:$4 sm:$0xff]   ;;  %34 = vst.msk [vmem:[#allocation2 + $0x58] sm:$0xff] %vm22_vm0, %v2057_v11  ;;  %35 = vst.msk [vmem:[#allocation2 + $0x60] sm:$0xff] %vm22_vm0, %v2057_v11  ;;  %v1679_v25 = vunpack.c.l.bf16 %v1695_v24  ;;  %v744_v27 = vld [vmem:[%s2690_s2 + $0x10] sm:$0xff]  ;;  %v1680_v28 = vunpack.c.h.bf16 %v1695_v24 }
  0x14   :  { %1706 = vmatprep.subr.bf16.mxu0 %v2003_v10  ;;  %1892 = vmatmul.mubr.msk.f32.gmra.mxu1 %vm22_vm0, %v1624_v32  ;;  %v2036_v10 = vld [vmem:[%s2689_s0 + $0x94] ss:$8 sps:$4 sm:$0xff]   ;;  %36 = vst.msk [vmem:[#allocation2 + $0x68] sm:$0xff] %vm22_vm0, %v2057_v11  ;;  %37 = vst.msk [vmem:[#allocation2 + $0x70] sm:$0xff] %vm22_vm0, %v2057_v11  ;;  %v2041_v26 = vld [vmem:[%s2689_s0 + $0xa0] ss:$8 sps:$4 sm:$0xff]  }
  0x15   :  { %1894 = vmatprep.mubr.msk.f32.mxu1 %vm22_vm0, %v1627_v34  ;;  %38 = vst.msk [vmem:[#allocation2 + $0x78] sm:$0xff] %vm22_vm0, %v2057_v11  ;;  %39 = vst.msk [vmem:[#allocation2 + $0x80] sm:$0xff] %vm22_vm0, %v2057_v11  ;;  %v2042_v29 = vld [vmem:[%s2689_s0 + $0xb4] ss:$8 sps:$4 sm:$0xff]   ;;  %v743_v30 = vld [vmem:[%s2690_s2 + $0x8] sm:$0xff] }
  0x16   :  { %40 = vst.msk [vmem:[#allocation2 + $0x88] sm:$0xff] %vm22_vm0, %v2057_v11  ;;  %41 = vst.msk [vmem:[#allocation2 + $0x90] sm:$0xff] %vm22_vm0, %v2057_v11  ;;  %v2044_v32 = vld [vmem:[%s2689_s0 + $0xb0] ss:$8 sps:$4 sm:$0xff]   ;;  %v2047_v34 = vld [vmem:[%s2689_s0 + $0xc0] ss:$8 sps:$4 sm:$0xff]  }
  0x17   :  { %1707 = vmatpush3.bf16.msra.mxu0 %v2004_v12  ;;  %42 = vst.msk [vmem:[#allocation2 + $0x98] sm:$0xff] %vm22_vm0, %v2057_v11  ;;  %43 = vst.msk [vmem:[#allocation2 + $0xa0] sm:$0xff] %vm22_vm0, %v2057_v11  ;;  %v1692_v12 = vld [vmem:[%s2688_s1 + $0x60] sm:$0xff]   ;;  %v2048_v35 = vld [vmem:[%s2689_s0 + $0xd4] ss:$8 sps:$4 sm:$0xff]  }
  0x18   :  { %1708 = vmatprep.subr.bf16.mxu0 %v2005_v13  ;;  %1895 = vmatmul.mubr.msk.f32.gmra.mxu1 %vm22_vm0, %v1628_v36  ;;  %44 = vst.msk [vmem:[#allocation2 + $0xa8] sm:$0xff] %vm22_vm0, %v2057_v11  ;;  %45 = vst.msk [vmem:[#allocation2 + $0xb0] sm:$0xff] %vm22_vm0, %v2057_v11  ;;  %v1667_v13 = vunpack.c.l.bf16 %v1692_v12  ;;  %v2050_v36 = vld [vmem:[%s2689_s0 + $0xd0] ss:$8 sps:$4 sm:$0xff]   ;;  %v2053_v38 = vld [vmem:[%s2689_s0 + $0xe0] ss:$8 sps:$4 sm:$0xff]  }
  0x19   :  { %1897 = vmatprep.mubr.msk.f32.mxu1 %vm22_vm0, %v1631_v37  ;;  %46 = vst.msk [vmem:[#allocation2 + $0xb8] sm:$0xff] %vm22_vm0, %v2057_v11  ;;  %47 = vst.msk [vmem:[#allocation2 + $0xc0] sm:$0xff] %vm22_vm0, %v2057_v11  ;;  %v2051_v37 = vld [vmem:[%s2689_s0 + $0xe4] ss:$8 sps:$4 sm:$0xff]  }
  0x1a   :  { %48 = vst.msk [vmem:[#allocation2 + $0xc8] sm:$0xff] %vm22_vm0, %v2057_v11  ;;  %49 = vst.msk [vmem:[#allocation2 + $0xd0] sm:$0xff] %vm22_vm0, %v2057_v11 }
  0x1b   :  { %1709 = vmatpush3.bf16.msra.mxu0 %v2006_v14  ;;  %50 = vst.msk [vmem:[#allocation2 + $0xd8] sm:$0xff] %vm22_vm0, %v2057_v11  ;;  %51 = vst.msk [vmem:[#allocation2 + $0xe0] sm:$0xff] %vm22_vm0, %v2057_v11  ;;  %v1668_v14 = vunpack.c.h.bf16 %v1692_v12 }
  0x1c   :  { %1710 = vmatprep.subr.bf16.mxu0 %v2007_v15  ;;  %1898 = vmatmul.mubr.msk.f32.gmra.mxu1 %vm22_vm0, %v1632_v40  ;;  %52 = vst.msk [vmem:[#allocation2 + $0xe8] sm:$0xff] %vm22_vm0, %v2057_v11  ;;  %53 = vst.msk [vmem:[#allocation2 + $0xf0] sm:$0xff] %vm22_vm0, %v2057_v11  ;;  %v1693_v15 = vld [vmem:[%s2688_s1 + $0x68] sm:$0xff]   ;;  %v2056_v40 = vld [vmem:[%s2689_s0 + $0xf0] ss:$8 sps:$4 sm:$0xff]  }
  0x1d   :  { %1900 = vmatprep.mubr.msk.f32.mxu1 %vm22_vm0, %v1635_v42  ;;  %54 = vst.msk [vmem:[#allocation2 + $0xf8] sm:$0xff] %vm22_vm0, %v2057_v11  ;;  %v92_v42 = vld [vmem:[#allocation2] sm:$0xff]  ;;  %v98_v11 = vld [vmem:[#allocation2 + $0x30] sm:$0xff] }
  0x1f   :  { %1711 = vmatpush3.bf16.msra.mxu0 %v2008_v16  ;;  %v1671_v16 = vunpack.c.l.bf16 %v1693_v15 }
  0x20   :  { %1901 = vmatmul.mubr.msk.f32.gmra.mxu1 %vm22_vm0, %v1636_v44 }
  0x21   :  { %1903 = vmatprep.mubr.msk.f32.mxu1 %vm22_vm0, %v1639_v45 }
  0x22   :  { %445 = vmatmul.mubr.bf16.vlgmr.msra.gmra.mxu0 %v2009_v17  ;;  %v2038_v17 = vld [vmem:[%s2689_s0 + $0x90] ss:$8 sps:$4 sm:$0xff]  }
  0x23   :  { %452 = vmatprep.mubr.bf16.mxu0 %v2012_v18  ;;  %v1672_v18 = vunpack.c.h.bf16 %v1693_v15 }
  0x24   :  { %1904 = vmatmul.mubr.msk.f32.gmra.mxu1 %vm22_vm0, %v1640_v48 }
  0x25   :  { %1906 = vmatprep.mubr.msk.f32.mxu1 %vm22_vm0, %v1643_v50 }
  0x28   :  { %1907 = vmatmul.mubr.msk.f32.gmra.mxu1 %vm22_vm0, %v1644_v52  ;;  %v94_v52 = vld [vmem:[#allocation2 + $0x10] sm:$0xff] }
  0x29   :  { %1909 = vmatprep.mubr.msk.f32.mxu1 %vm22_vm0, %v1647_v53 }
  0x2a   :  { %453 = vmatmul.mubr.bf16.gmra.mxu0 %v2014_v21  ;;  %v1675_v21 = vunpack.c.l.bf16 %v1694_v20 }
  0x2b   :  { %460 = vmatprep.mubr.bf16.mxu0 %v2015_v23  ;;  %v745_v23 = vld [vmem:[%s2690_s2 + $0x18] sm:$0xff] }
  0x2c   :  { %1910 = vmatmul.mubr.msk.f32.gmra.mxu1 %vm22_vm0, %v1648_v56  ;;  %1936 = vmatprep.subr.mxu1 %v745_v23 }
  0x2d   :  { %1912 = vmatprep.mubr.msk.f32.mxu1 %vm22_vm0, %v1651_v58  ;;  %1937 = vmatpush3.msra.mxu1 %v745_v23  ;;  %v100_v23 = vld [vmem:[#allocation2 + $0x40] sm:$0xff] }
  0x2e   :  { %1938 = vmatprep.subr.mxu1 %v744_v27 }
  0x2f   :  { %1939 = vmatpush3.msra.mxu1 %v744_v27 }
  0x30   :  { %1913 = vmatmul.mubr.msk.f32.gmra.mxu1 %vm22_vm0, %v1652_v60  ;;  %1940 = vmatprep.subr.mxu1 %v743_v30 }
  0x31   :  { %1915 = vmatprep.mubr.msk.f32.mxu1 %vm22_vm0, %v1655_v61  ;;  %1941 = vmatpush3.msra.mxu1 %v743_v30 }
  0x32   :  { %461 = vmatmul.mubr.bf16.gmra.mxu0 %v2017_v31  ;;  %v742_v31 = vld [vmem:[%s2690_s2] sm:$0xff] }
  0x33   :  { %468 = vmatprep.mubr.bf16.mxu0 %v2018_v33  ;;  %1942 = vmatprep.subr.mxu1 %v742_v31  ;;  %v2045_v33 = vld [vmem:[%s2689_s0 + $0xc4] ss:$8 sps:$4 sm:$0xff]  }
  0x34   :  { %1916 = vmatmul.mubr.msk.f32.gmra.mxu1 %vm22_vm0, %v1656_v0 }
  0x35   :  { %1918 = vmatprep.mubr.msk.f32.mxu1 %vm22_vm0, %v1659_v2  ;;  %1943 = vmatpush3.msra.mxu1 %v742_v31 }
  0x38   :  { %1919 = vmatmul.mubr.msk.f32.gmra.mxu1 %vm22_vm0, %v1660_v4 }
  0x39   :  { %1921 = vmatprep.mubr.msk.f32.mxu1 %vm22_vm0, %v1663_v5  ;;  %v97_v5 = vld [vmem:[#allocation2 + $0x28] sm:$0xff] }
  0x3a   :  { %469 = vmatmul.mubr.bf16.gmra.mxu0 %v2020_v39  ;;  %v2054_v39 = vld [vmem:[%s2689_s0 + $0xf4] ss:$8 sps:$4 sm:$0xff]  }
  0x3b   :  { %476 = vmatprep.mubr.bf16.mxu0 %v2021_v41 }
  0x3c   :  { %1922 = vmatmul.mubr.msk.f32.gmra.mxu1 %vm22_vm0, %v1664_v7 }
  0x3d   :  { %1924 = vmatprep.mubr.msk.f32.mxu1 %vm22_vm0, %v1667_v13 }
  0x40   :  { %1925 = vmatmul.mubr.msk.f32.gmra.mxu1 %vm22_vm0, %v1668_v14 }
  0x41   :  { %1927 = vmatprep.mubr.msk.f32.mxu1 %vm22_vm0, %v1671_v16 }
  0x42   :  { %477 = vmatmul.mubr.bf16.gmra.mxu0 %v2023_v47  ;;  %v93_v47 = vld [vmem:[#allocation2 + $0x8] sm:$0xff] }
  0x43   :  { %484 = vmatprep.mubr.bf16.mxu0 %v2024_v49 }
  0x44   :  { %1928 = vmatmul.mubr.msk.f32.gmra.mxu1 %vm22_vm0, %v1672_v18 }
  0x45   :  { %1930 = vmatprep.mubr.msk.f32.mxu1 %vm22_vm0, %v1675_v21 }
  0x48   :  { %1931 = vmatmul.mubr.msk.f32.gmra.mxu1 %vm22_vm0, %v1676_v22 }
  0x49   :  { %1933 = vmatprep.mubr.msk.f32.mxu1 %vm22_vm0, %v1679_v25 }
  0x4a   :  { %485 = vmatmul.mubr.bf16.gmra.mxu0 %v2026_v55 }
  0x4b   :  { %492 = vmatprep.mubr.bf16.mxu0 %v2027_v57  ;;  %v95_v57 = vld [vmem:[#allocation2 + $0x18] sm:$0xff] }
  0x4c   :  { %1934 = vmatmul.mubr.msk.f32.gmra.mxu1 %vm22_vm0, %v1680_v28 }
  0x52   :  { %493 = vmatmul.mubr.bf16.gmra.mxu0 %v2029_v63  ;;  %v96_v63 = vld [vmem:[#allocation2 + $0x20] sm:$0xff] }
  0x53   :  { %500 = vmatprep.mubr.bf16.mxu0 %v2030_v1 }
  0x5a   :  { %501 = vmatmul.mubr.bf16.gmra.mxu0 %v2032_v6 }
  0x5b   :  { %508 = vmatprep.mubr.bf16.mxu0 %v2033_v8 }
  0x62   :  { %509 = vmatmul.mubr.bf16.gmra.mxu0 %v2035_v9 }
  0x63   :  { %516 = vmatprep.mubr.bf16.mxu0 %v2036_v10 }
  0x6a   :  { %517 = vmatmul.mubr.bf16.gmra.mxu0 %v2038_v17  ;;  %v99_v17 = vld [vmem:[#allocation2 + $0x38] sm:$0xff] }
  0x6b   :  { %524 = vmatprep.mubr.bf16.mxu0 %v2039_v19 }
  0x72   :  { %525 = vmatmul.mubr.bf16.gmra.mxu0 %v2041_v26 }
  0x73   :  { %532 = vmatprep.mubr.bf16.mxu0 %v2042_v29  ;;  %v101_v29 = vld [vmem:[#allocation2 + $0x48] sm:$0xff] }
  0x7a   :  { %533 = vmatmul.mubr.bf16.gmra.mxu0 %v2044_v32 }
  0x7b   :  { %540 = vmatprep.mubr.bf16.mxu0 %v2045_v33 }
  0x82   :  { %541 = vmatmul.mubr.bf16.gmra.mxu0 %v2047_v34 }
  0x83   :  { %548 = vmatprep.mubr.bf16.mxu0 %v2048_v35  ;;  %v102_v35 = vld [vmem:[#allocation2 + $0x50] sm:$0xff] }
  0x8a   :  { %549 = vmatmul.mubr.bf16.gmra.mxu0 %v2050_v36 }
  0x8b   :  { %556 = vmatprep.mubr.bf16.mxu0 %v2051_v37 }
  0x92   :  { %557 = vmatmul.mubr.bf16.gmra.mxu0 %v2053_v38 }
  0x93   :  { %564 = vmatprep.mubr.bf16.mxu0 %v2054_v39 }
  0x9a   :  { %565 = vmatmul.mubr.bf16.gmra.mxu0 %v2056_v40 }
  0xe2   :  { %v1712_v41 = vpop.f32.mrf.mxu0 }
  0xe4   :  { %v1713_v43 = vpop.f32.mrf.mxu0 }
  0xe5   :  { %v1714_v44 = vadd.f32 %v1713_v43, %v1712_v41  ;;  %v103_v41 = vld [vmem:[#allocation2 + $0x58] sm:$0xff] }
  0xe6   :  { %v1715_v45 = vpop.f32.mrf.mxu0 }
  0xe7   :  { %v573_v46 = vadd.f32 %v1714_v44, %v92_v42 }
  0xe8   :  { %v1716_v48 = vpop.f32.mrf.mxu0 }
  0xe9   :  { %606 = vst.msk [vmem:[#allocation2] sm:$0xff] %vm22_vm0, %v573_v46  ;;  %v1717_v49 = vadd.f32 %v1716_v48, %v1715_v45 }
  0xea   :  { %v1718_v50 = vpop.f32.mrf.mxu0 }
  0xeb   :  { %v574_v51 = vadd.f32 %v1717_v49, %v93_v47  ;;  %v104_v47 = vld [vmem:[#allocation2 + $0x60] sm:$0xff] }
  0xec   :  { %v1719_v53 = vpop.f32.mrf.mxu0 }
  0xed   :  { %607 = vst.msk [vmem:[#allocation2 + $0x8] sm:$0xff] %vm22_vm0, %v574_v51  ;;  %v1720_v54 = vadd.f32 %v1719_v53, %v1718_v50  ;;  %v105_v53 = vld [vmem:[#allocation2 + $0x68] sm:$0xff] }
  0xee   :  { %v1721_v55 = vpop.f32.mrf.mxu0 }
  0xef   :  { %v575_v56 = vadd.f32 %v1720_v54, %v94_v52 }
  0xf0   :  { %v1722_v58 = vpop.f32.mrf.mxu0  ;;  %v710_v59 = vld [vmem:[#allocation2] sm:$0xff] }
  0xf1   :  { %608 = vst.msk [vmem:[#allocation2 + $0x10] sm:$0xff] %vm22_vm0, %v575_v56  ;;  %v1723_v60 = vadd.f32 %v1722_v58, %v1721_v55  ;;  %1944 = vmatprep.mubr.msk.f32.mxu1 %vm22_vm0, %v710_v59  ;;  %v106_v59 = vld [vmem:[#allocation2 + $0x70] sm:$0xff] }
  0xf2   :  { %v1724_v61 = vpop.f32.mrf.mxu0 }
  0xf3   :  { %v576_v62 = vadd.f32 %v1723_v60, %v95_v57 }
  0xf4   :  { %v1725_v0 = vpop.f32.mrf.mxu0  ;;  %v711_v1 = vld [vmem:[#allocation2 + $0x8] sm:$0xff] }
  0xf5   :  { %609 = vst.msk [vmem:[#allocation2 + $0x18] sm:$0xff] %vm22_vm0, %v576_v62  ;;  %v1726_v2 = vadd.f32 %v1725_v0, %v1724_v61  ;;  %1945 = vmatmul.mubr.msk.f32.vlgmr.msra.gmra.mxu1 %vm22_vm0, %v711_v1  ;;  %v107_v1 = vld [vmem:[#allocation2 + $0x78] sm:$0xff] }
  0xf6   :  { %v1727_v3 = vpop.f32.mrf.mxu0 }
  0xf7   :  { %v577_v4 = vadd.f32 %v1726_v2, %v96_v63 }
  0xf8   :  { %v1728_v6 = vpop.f32.mrf.mxu0  ;;  %v712_v7 = vld [vmem:[#allocation2 + $0x10] sm:$0xff] }
  0xf9   :  { %610 = vst.msk [vmem:[#allocation2 + $0x20] sm:$0xff] %vm22_vm0, %v577_v4  ;;  %v1729_v8 = vadd.f32 %v1728_v6, %v1727_v3  ;;  %1947 = vmatprep.mubr.msk.f32.mxu1 %vm22_vm0, %v712_v7  ;;  %v108_v7 = vld [vmem:[#allocation2 + $0x80] sm:$0xff] }
  0xfa   :  { %v1730_v9 = vpop.f32.mrf.mxu0 }
  0xfb   :  { %v578_v10 = vadd.f32 %v1729_v8, %v97_v5 }
  0xfc   :  { %v1731_v12 = vpop.f32.mrf.mxu0  ;;  %v713_v13 = vld [vmem:[#allocation2 + $0x18] sm:$0xff] }
  0xfd   :  { %611 = vst.msk [vmem:[#allocation2 + $0x28] sm:$0xff] %vm22_vm0, %v578_v10  ;;  %v1732_v14 = vadd.f32 %v1731_v12, %v1730_v9  ;;  %1948 = vmatmul.mubr.msk.f32.gmra.mxu1 %vm22_vm0, %v713_v13  ;;  %v109_v13 = vld [vmem:[#allocation2 + $0x88] sm:$0xff] }
  0xfe   :  { %v1733_v15 = vpop.f32.mrf.mxu0 }
  0xff   :  { %v579_v16 = vadd.f32 %v1732_v14, %v98_v11 }
 0x100   :  { %v1734_v18 = vpop.f32.mrf.mxu0  ;;  %v714_v19 = vld [vmem:[#allocation2 + $0x20] sm:$0xff] }
 0x101   :  { %612 = vst.msk [vmem:[#allocation2 + $0x30] sm:$0xff] %vm22_vm0, %v579_v16  ;;  %v1735_v20 = vadd.f32 %v1734_v18, %v1733_v15  ;;  %1950 = vmatprep.mubr.msk.f32.mxu1 %vm22_vm0, %v714_v19  ;;  %v110_v19 = vld [vmem:[#allocation2 + $0x90] sm:$0xff] }
 0x102   :  { %v1736_v21 = vpop.f32.mrf.mxu0 }
 0x103   :  { %v580_v22 = vadd.f32 %v1735_v20, %v99_v17 }
 0x104   :  { %v1737_v24 = vpop.f32.mrf.mxu0  ;;  %v715_v25 = vld [vmem:[#allocation2 + $0x28] sm:$0xff] }
 0x105   :  { %613 = vst.msk [vmem:[#allocation2 + $0x38] sm:$0xff] %vm22_vm0, %v580_v22  ;;  %v1738_v26 = vadd.f32 %v1737_v24, %v1736_v21  ;;  %1951 = vmatmul.mubr.msk.f32.gmra.mxu1 %vm22_vm0, %v715_v25  ;;  %v111_v25 = vld [vmem:[#allocation2 + $0x98] sm:$0xff] }
 0x106   :  { %v1739_v27 = vpop.f32.mrf.mxu0 }
 0x107   :  { %v581_v28 = vadd.f32 %v1738_v26, %v100_v23 }
 0x108   :  { %v1740_v30 = vpop.f32.mrf.mxu0  ;;  %v716_v31 = vld [vmem:[#allocation2 + $0x30] sm:$0xff] }
 0x109   :  { %614 = vst.msk [vmem:[#allocation2 + $0x40] sm:$0xff] %vm22_vm0, %v581_v28  ;;  %v1741_v32 = vadd.f32 %v1740_v30, %v1739_v27  ;;  %1953 = vmatprep.mubr.msk.f32.mxu1 %vm22_vm0, %v716_v31  ;;  %v112_v31 = vld [vmem:[#allocation2 + $0xa0] sm:$0xff] }
 0x10a   :  { %v1742_v33 = vpop.f32.mrf.mxu0 }
 0x10b   :  { %v582_v34 = vadd.f32 %v1741_v32, %v101_v29 }
 0x10c   :  { %v1743_v36 = vpop.f32.mrf.mxu0  ;;  %v717_v37 = vld [vmem:[#allocation2 + $0x38] sm:$0xff] }
 0x10d   :  { %615 = vst.msk [vmem:[#allocation2 + $0x48] sm:$0xff] %vm22_vm0, %v582_v34  ;;  %v1744_v38 = vadd.f32 %v1743_v36, %v1742_v33  ;;  %1954 = vmatmul.mubr.msk.f32.gmra.mxu1 %vm22_vm0, %v717_v37 }
 0x10e   :  { %v1745_v39 = vpop.f32.mrf.mxu0 }
 0x10f   :  { %v583_v40 = vadd.f32 %v1744_v38, %v102_v35  ;;  %v2401_v35 = vpop.f32.mrf.mxu1  ;;  %v113_v38 = vld [vmem:[#allocation2 + $0xa8] sm:$0xff] }
 0x110   :  { %v1746_v42 = vpop.f32.mrf.mxu0  ;;  %v718_v43 = vld [vmem:[#allocation2 + $0x40] sm:$0xff] }
 0x111   :  { %616 = vst.msk [vmem:[#allocation2 + $0x50] sm:$0xff] %vm22_vm0, %v583_v40  ;;  %v1747_v44 = vadd.f32 %v1746_v42, %v1745_v39  ;;  %1956 = vmatprep.mubr.msk.f32.mxu1 %vm22_vm0, %v718_v43  ;;  %v2405_v42 = vpop.f32.mrf.mxu1 }
 0x112   :  { %v1748_v45 = vpop.f32.mrf.mxu0 }
 0x113   :  { %v584_v46 = vadd.f32 %v1747_v44, %v103_v41 }
 0x114   :  { %v1749_v48 = vpop.f32.mrf.mxu0  ;;  %v719_v49 = vld [vmem:[#allocation2 + $0x48] sm:$0xff] }
 0x115   :  { %617 = vst.msk [vmem:[#allocation2 + $0x58] sm:$0xff] %vm22_vm0, %v584_v46  ;;  %v1750_v50 = vadd.f32 %v1749_v48, %v1748_v45  ;;  %1957 = vmatmul.mubr.msk.f32.gmra.mxu1 %vm22_vm0, %v719_v49  ;;  %v114_v45 = vld [vmem:[#allocation2 + $0xb0] sm:$0xff]  ;;  %v2409_v49 = vpop.f32.mrf.mxu1 }
 0x116   :  { %v1751_v51 = vpop.f32.mrf.mxu0 }
 0x117   :  { %v585_v52 = vadd.f32 %v1750_v50, %v104_v47 }
 0x118   :  { %v1752_v54 = vpop.f32.mrf.mxu0  ;;  %v720_v55 = vld [vmem:[#allocation2 + $0x50] sm:$0xff] }
 0x119   :  { %618 = vst.msk [vmem:[#allocation2 + $0x60] sm:$0xff] %vm22_vm0, %v585_v52  ;;  %v1753_v56 = vadd.f32 %v1752_v54, %v1751_v51  ;;  %1959 = vmatprep.mubr.msk.f32.mxu1 %vm22_vm0, %v720_v55  ;;  %v115_v52 = vld [vmem:[#allocation2 + $0xb8] sm:$0xff] }
 0x11a   :  { %v1754_v57 = vpop.f32.mrf.mxu0 }
 0x11b   :  { %v586_v58 = vadd.f32 %v1753_v56, %v105_v53  ;;  %v2413_v56 = vpop.f32.mrf.mxu1 }
 0x11c   :  { %v1755_v60 = vpop.f32.mrf.mxu0  ;;  %v721_v61 = vld [vmem:[#allocation2 + $0x58] sm:$0xff] }
 0x11d   :  { %619 = vst.msk [vmem:[#allocation2 + $0x68] sm:$0xff] %vm22_vm0, %v586_v58  ;;  %v1756_v62 = vadd.f32 %v1755_v60, %v1754_v57  ;;  %1960 = vmatmul.mubr.msk.f32.gmra.mxu1 %vm22_vm0, %v721_v61 }
 0x11e   :  { %v1757_v63 = vpop.f32.mrf.mxu0 }
 0x11f   :  { %v587_v0 = vadd.f32 %v1756_v62, %v106_v59  ;;  %v116_v59 = vld [vmem:[#allocation2 + $0xc0] sm:$0xff] }
 0x120   :  { %v1758_v2 = vpop.f32.mrf.mxu0  ;;  %v722_v3 = vld [vmem:[#allocation2 + $0x60] sm:$0xff] }
 0x121   :  { %620 = vst.msk [vmem:[#allocation2 + $0x70] sm:$0xff] %vm22_vm0, %v587_v0  ;;  %v1759_v4 = vadd.f32 %v1758_v2, %v1757_v63  ;;  %1962 = vmatprep.mubr.msk.f32.mxu1 %vm22_vm0, %v722_v3  ;;  %v2417_v63 = vpop.f32.mrf.mxu1  ;;  %v117_v2 = vld [vmem:[#allocation2 + $0xc8] sm:$0xff] }
 0x122   :  { %v1760_v5 = vpop.f32.mrf.mxu0 }
 0x123   :  { %v588_v6 = vadd.f32 %v1759_v4, %v107_v1 }
 0x124   :  { %v1761_v8 = vpop.f32.mrf.mxu0  ;;  %v723_v9 = vld [vmem:[#allocation2 + $0x68] sm:$0xff] }
 0x125   :  { %621 = vst.msk [vmem:[#allocation2 + $0x78] sm:$0xff] %vm22_vm0, %v588_v6  ;;  %v1762_v10 = vadd.f32 %v1761_v8, %v1760_v5  ;;  %1963 = vmatmul.mubr.msk.f32.gmra.mxu1 %vm22_vm0, %v723_v9  ;;  %v2421_v6 = vpop.f32.mrf.mxu1  ;;  %v118_v9 = vld [vmem:[#allocation2 + $0xd0] sm:$0xff] }
 0x126   :  { %v1763_v11 = vpop.f32.mrf.mxu0 }
 0x127   :  { %v589_v12 = vadd.f32 %v1762_v10, %v108_v7 }
 0x128   :  { %v1764_v14 = vpop.f32.mrf.mxu0  ;;  %v724_v15 = vld [vmem:[#allocation2 + $0x70] sm:$0xff] }
 0x129   :  { %622 = vst.msk [vmem:[#allocation2 + $0x80] sm:$0xff] %vm22_vm0, %v589_v12  ;;  %v1765_v16 = vadd.f32 %v1764_v14, %v1763_v11  ;;  %1965 = vmatprep.mubr.msk.f32.mxu1 %vm22_vm0, %v724_v15 }
 0x12a   :  { %v1766_v17 = vpop.f32.mrf.mxu0 }
 0x12b   :  { %v590_v18 = vadd.f32 %v1765_v16, %v109_v13  ;;  %v2425_v13 = vpop.f32.mrf.mxu1  ;;  %v119_v16 = vld [vmem:[#allocation2 + $0xd8] sm:$0xff] }
 0x12c   :  { %v1767_v20 = vpop.f32.mrf.mxu0  ;;  %v725_v21 = vld [vmem:[#allocation2 + $0x78] sm:$0xff] }
 0x12d   :  { %623 = vst.msk [vmem:[#allocation2 + $0x88] sm:$0xff] %vm22_vm0, %v590_v18  ;;  %v1768_v22 = vadd.f32 %v1767_v20, %v1766_v17  ;;  %1966 = vmatmul.mubr.msk.f32.gmra.mxu1 %vm22_vm0, %v725_v21  ;;  %v2429_v20 = vpop.f32.mrf.mxu1 }
 0x12e   :  { %v1769_v23 = vpop.f32.mrf.mxu0 }
 0x12f   :  { %v591_v24 = vadd.f32 %v1768_v22, %v110_v19 }
 0x130   :  { %v1770_v26 = vpop.f32.mrf.mxu0  ;;  %v726_v27 = vld [vmem:[#allocation2 + $0x80] sm:$0xff] }
 0x131   :  { %624 = vst.msk [vmem:[#allocation2 + $0x90] sm:$0xff] %vm22_vm0, %v591_v24  ;;  %v1771_v28 = vadd.f32 %v1770_v26, %v1769_v23  ;;  %1968 = vmatprep.mubr.msk.f32.mxu1 %vm22_vm0, %v726_v27  ;;  %v120_v23 = vld [vmem:[#allocation2 + $0xe0] sm:$0xff]  ;;  %v2433_v27 = vpop.f32.mrf.mxu1 }
 0x132   :  { %v1772_v29 = vpop.f32.mrf.mxu0 }
 0x133   :  { %v592_v30 = vadd.f32 %v1771_v28, %v111_v25 }
 0x134   :  { %v1773_v32 = vpop.f32.mrf.mxu0  ;;  %v727_v33 = vld [vmem:[#allocation2 + $0x88] sm:$0xff] }
 0x135   :  { %625 = vst.msk [vmem:[#allocation2 + $0x98] sm:$0xff] %vm22_vm0, %v592_v30  ;;  %v1774_v34 = vadd.f32 %v1773_v32, %v1772_v29  ;;  %1969 = vmatmul.mubr.msk.f32.gmra.mxu1 %vm22_vm0, %v727_v33  ;;  %v121_v30 = vld [vmem:[#allocation2 + $0xe8] sm:$0xff] }
 0x136   :  { %v1775_v36 = vpop.f32.mrf.mxu0 }
 0x137   :  { %v593_v37 = vadd.f32 %v1774_v34, %v112_v31  ;;  %v2437_v34 = vpop.f32.mrf.mxu1 }
 0x138   :  { %v1776_v39 = vpop.f32.mrf.mxu0  ;;  %v728_v40 = vld [vmem:[#allocation2 + $0x90] sm:$0xff] }
 0x139   :  { %626 = vst.msk [vmem:[#allocation2 + $0xa0] sm:$0xff] %vm22_vm0, %v593_v37  ;;  %v1777_v41 = vadd.f32 %v1776_v39, %v1775_v36  ;;  %1971 = vmatprep.mubr.msk.f32.mxu1 %vm22_vm0, %v728_v40 }
 0x13a   :  { %v1778_v43 = vpop.f32.mrf.mxu0 }
 0x13b   :  { %v594_v44 = vadd.f32 %v1777_v41, %v113_v38  ;;  %v122_v38 = vld [vmem:[#allocation2 + $0xf0] sm:$0xff] }
 0x13c   :  { %v1779_v46 = vpop.f32.mrf.mxu0  ;;  %v729_v47 = vld [vmem:[#allocation2 + $0x98] sm:$0xff] }
 0x13d   :  { %627 = vst.msk [vmem:[#allocation2 + $0xa8] sm:$0xff] %vm22_vm0, %v594_v44  ;;  %v1780_v48 = vadd.f32 %v1779_v46, %v1778_v43  ;;  %1972 = vmatmul.mubr.msk.f32.gmra.mxu1 %vm22_vm0, %v729_v47  ;;  %v2441_v43 = vpop.f32.mrf.mxu1  ;;  %v123_v46 = vld [vmem:[#allocation2 + $0xf8] sm:$0xff] }
 0x13e   :  { %v1781_v50 = vpop.f32.mrf.mxu0 }
 0x13f   :  { %v595_v51 = vadd.f32 %v1780_v48, %v114_v45 }
 0x140   :  { %v1782_v53 = vpop.f32.mrf.mxu0  ;;  %v730_v54 = vld [vmem:[#allocation2 + $0xa0] sm:$0xff] }
 0x141   :  { %628 = vst.msk [vmem:[#allocation2 + $0xb0] sm:$0xff] %vm22_vm0, %v595_v51  ;;  %v1783_v55 = vadd.f32 %v1782_v53, %v1781_v50  ;;  %1974 = vmatprep.mubr.msk.f32.mxu1 %vm22_vm0, %v730_v54  ;;  %v2445_v51 = vpop.f32.mrf.mxu1 }
 0x142   :  { %v1784_v57 = vpop.f32.mrf.mxu0 }
 0x143   :  { %v596_v58 = vadd.f32 %v1783_v55, %v115_v52  ;;  %v2449_v54 = vpop.f32.mrf.mxu1 }
 0x144   :  { %v1785_v60 = vpop.f32.mrf.mxu0  ;;  %v731_v61 = vld [vmem:[#allocation2 + $0xa8] sm:$0xff] }
 0x145   :  { %629 = vst.msk [vmem:[#allocation2 + $0xb8] sm:$0xff] %vm22_vm0, %v596_v58  ;;  %v1786_v62 = vadd.f32 %v1785_v60, %v1784_v57  ;;  %1975 = vmatmul.mubr.msk.f32.gmra.mxu1 %vm22_vm0, %v731_v61  ;;  %v2452_v57 = vpop.f32.mrf.mxu1 }
 0x146   :  { %v1787_v0 = vpop.f32.mrf.mxu0 }
 0x147   :  { %v597_v1 = vadd.f32 %v1786_v62, %v116_v59  ;;  %v2455_v59 = vpop.f32.mrf.mxu1 }
 0x148   :  { %v1788_v3 = vpop.f32.mrf.mxu0  ;;  %v732_v4 = vld [vmem:[#allocation2 + $0xb0] sm:$0xff] }
 0x149   :  { %630 = vst.msk [vmem:[#allocation2 + $0xc0] sm:$0xff] %vm22_vm0, %v597_v1  ;;  %v1789_v5 = vadd.f32 %v1788_v3, %v1787_v0  ;;  %1977 = vmatprep.mubr.msk.f32.mxu1 %vm22_vm0, %v732_v4  ;;  %v2457_v60 = vpop.f32.mrf.mxu1 }
 0x14a   :  { %v1790_v7 = vpop.f32.mrf.mxu0 }
 0x14b   :  { %v598_v8 = vadd.f32 %v1789_v5, %v117_v2  ;;  %v2459_v61 = vpop.f32.mrf.mxu1 }
 0x14c   :  { %v1791_v10 = vpop.f32.mrf.mxu0  ;;  %v733_v11 = vld [vmem:[#allocation2 + $0xb8] sm:$0xff] }
 0x14d   :  { %631 = vst.msk [vmem:[#allocation2 + $0xc8] sm:$0xff] %vm22_vm0, %v598_v8  ;;  %v1792_v12 = vadd.f32 %v1791_v10, %v1790_v7  ;;  %1978 = vmatmul.mubr.msk.f32.gmra.mxu1 %vm22_vm0, %v733_v11  ;;  %v2461_v62 = vpop.f32.mrf.mxu1 }
 0x14e   :  { %v1793_v14 = vpop.f32.mrf.mxu0 }
 0x14f   :  { %v599_v15 = vadd.f32 %v1792_v12, %v118_v9  ;;  %v2463_v0 = vpop.f32.mrf.mxu1 }
 0x150   :  { %v1794_v17 = vpop.f32.mrf.mxu0  ;;  %v734_v18 = vld [vmem:[#allocation2 + $0xc0] sm:$0xff] }
 0x151   :  { %632 = vst.msk [vmem:[#allocation2 + $0xd0] sm:$0xff] %vm22_vm0, %v599_v15  ;;  %v1795_v19 = vadd.f32 %v1794_v17, %v1793_v14  ;;  %1980 = vmatprep.mubr.msk.f32.mxu1 %vm22_vm0, %v734_v18  ;;  %v2465_v1 = vpop.f32.mrf.mxu1  ;;  %v2494_v17 = vld [vmem:[%s2691_s3] ss:$0 sm:$0xff] }
 0x152   :  { %v1796_v21 = vpop.f32.mrf.mxu0 }
 0x153   :  { %v600_v22 = vadd.f32 %v1795_v19, %v119_v16  ;;  %v2467_v2 = vpop.f32.mrf.mxu1 }
 0x154   :  { %v1797_v24 = vpop.f32.mrf.mxu0  ;;  %v735_v25 = vld [vmem:[#allocation2 + $0xc8] sm:$0xff] }
 0x155   :  { %633 = vst.msk [vmem:[#allocation2 + $0xd8] sm:$0xff] %vm22_vm0, %v600_v22  ;;  %v1798_v26 = vadd.f32 %v1797_v24, %v1796_v21  ;;  %1981 = vmatmul.mubr.msk.f32.gmra.mxu1 %vm22_vm0, %v735_v25  ;;  %v2469_v3 = vpop.f32.mrf.mxu1 }
 0x156   :  { %v1799_v28 = vpop.f32.mrf.mxu0 }
 0x157   :  { %v601_v29 = vadd.f32 %v1798_v26, %v120_v23  ;;  %v2471_v4 = vpop.f32.mrf.mxu1 }
 0x158   :  { %v1800_v31 = vpop.f32.mrf.mxu0  ;;  %v736_v32 = vld [vmem:[#allocation2 + $0xd0] sm:$0xff] }
 0x159   :  { %634 = vst.msk [vmem:[#allocation2 + $0xe0] sm:$0xff] %vm22_vm0, %v601_v29  ;;  %v1801_v33 = vadd.f32 %v1800_v31, %v1799_v28  ;;  %1983 = vmatprep.mubr.msk.f32.mxu1 %vm22_vm0, %v736_v32  ;;  %v2473_v5 = vpop.f32.mrf.mxu1 }
 0x15a   :  { %v1802_v36 = vpop.f32.mrf.mxu0 }
 0x15b   :  { %v602_v37 = vadd.f32 %v1801_v33, %v121_v30  ;;  %v2475_v7 = vpop.f32.mrf.mxu1 }
 0x15c   :  { %v1803_v39 = vpop.f32.mrf.mxu0  ;;  %v737_v40 = vld [vmem:[#allocation2 + $0xd8] sm:$0xff] }
 0x15d   :  { %635 = vst.msk [vmem:[#allocation2 + $0xe8] sm:$0xff] %vm22_vm0, %v602_v37  ;;  %v1804_v41 = vadd.f32 %v1803_v39, %v1802_v36  ;;  %1984 = vmatmul.mubr.msk.f32.gmra.mxu1 %vm22_vm0, %v737_v40  ;;  %v2477_v8 = vpop.f32.mrf.mxu1 }
 0x15e   :  { %v1805_v44 = vpop.f32.mrf.mxu0 }
 0x15f   :  { %v603_v45 = vadd.f32 %v1804_v41, %v122_v38  ;;  %v2479_v9 = vpop.f32.mrf.mxu1 }
 0x160   :  { %v1806_v47 = vpop.f32.mrf.mxu0  ;;  %v738_v48 = vld [vmem:[#allocation2 + $0xe0] sm:$0xff] }
 0x161   :  { %636 = vst.msk [vmem:[#allocation2 + $0xf0] sm:$0xff] %vm22_vm0, %v603_v45  ;;  %v1807_v50 = vadd.f32 %v1806_v47, %v1805_v44  ;;  %1986 = vmatprep.mubr.msk.f32.mxu1 %vm22_vm0, %v738_v48  ;;  %v2481_v10 = vpop.f32.mrf.mxu1 }
 0x163   :  { %v604_v52 = vadd.f32 %v1807_v50, %v123_v46  ;;  %v2483_v11 = vpop.f32.mrf.mxu1 }
 0x164   :  { %v739_v53 = vld [vmem:[#allocation2 + $0xe8] sm:$0xff] }
 0x165   :  { %637 = vst.msk [vmem:[#allocation2 + $0xf8] sm:$0xff] %vm22_vm0, %v604_v52  ;;  %1987 = vmatmul.mubr.msk.f32.gmra.mxu1 %vm22_vm0, %v739_v53  ;;  %v2485_v12 = vpop.f32.mrf.mxu1 }
 0x167   :  { %v2487_v14 = vpop.f32.mrf.mxu1 }
 0x168   :  { %v740_v55 = vld [vmem:[#allocation2 + $0xf0] sm:$0xff] }
 0x169   :  { %1989 = vmatprep.mubr.msk.f32.mxu1 %vm22_vm0, %v740_v55  ;;  %v2489_v15 = vpop.f32.mrf.mxu1 }
 0x16c   :  { %v741_v58 = vld [vmem:[#allocation2 + $0xf8] sm:$0xff] }
 0x16d   :  { %1990 = vmatmul.mubr.msk.f32.gmra.mxu1 %vm22_vm0, %v741_v58 }
 0x1b5   :  { %v1946_v16 = vpop.f32.mrf.mxu1 }
 0x1b6   :  { %v1239_v18 = vadd.f32 %v1946_v16, %v2401_v35 }
 0x1b7   :  { %v1233_v19 = vpop.f32.mrf.mxu1 }
 0x1b8   :  { %v1400_v21 = vadd.f32 %v2494_v17, %v1239_v18  ;;  %v1234_v22 = vadd.f32 %v1233_v19, %v2405_v42 }
 0x1ba   :  { %v1432_v23 = vmax.f32 %v1400_v21, 0.0  ;;  %v1399_v24 = vadd.f32 %v2494_v17, %v1234_v22 }
 0x1bc   :  { %1465 = vst.msk [vmem:[%s2692_s4 + $0x8] sm:$0xff] %vm1463_vm1, %v1432_v23  ;;  %v1431_v25 = vmax.f32 %v1399_v24, 0.0 }
 0x1bd   :  { %v1949_v26 = vpop.f32.mrf.mxu1 }
 0x1be   :  { %1464 = vst.msk [vmem:[%s2692_s4] sm:$0xff] %vm1463_vm1, %v1431_v25  ;;  %v1249_v35 = vadd.f32 %v1949_v26, %v2409_v49 }
 0x1bf   :  { %v1243_v28 = vpop.f32.mrf.mxu1 }
 0x1c0   :  { %v1402_v42 = vadd.f32 %v2494_v17, %v1249_v35  ;;  %v1244_v29 = vadd.f32 %v1243_v28, %v2413_v56 }
 0x1c2   :  { %v1434_v30 = vmax.f32 %v1402_v42, 0.0  ;;  %v1401_v31 = vadd.f32 %v2494_v17, %v1244_v29 }
 0x1c4   :  { %1467 = vst.msk [vmem:[%s2692_s4 + $0x18] sm:$0xff] %vm1463_vm1, %v1434_v30  ;;  %v1433_v32 = vmax.f32 %v1401_v31, 0.0 }
 0x1c5   :  { %v1952_v33 = vpop.f32.mrf.mxu1 }
 0x1c6   :  { %1466 = vst.msk [vmem:[%s2692_s4 + $0x10] sm:$0xff] %vm1463_vm1, %v1433_v32  ;;  %v1259_v49 = vadd.f32 %v1952_v33, %v2417_v63 }
 0x1c7   :  { %v1253_v36 = vpop.f32.mrf.mxu1 }
 0x1c8   :  { %v1404_v56 = vadd.f32 %v2494_v17, %v1259_v49  ;;  %v1254_v37 = vadd.f32 %v1253_v36, %v2421_v6 }
 0x1ca   :  { %v1436_v38 = vmax.f32 %v1404_v56, 0.0  ;;  %v1403_v39 = vadd.f32 %v2494_v17, %v1254_v37 }
 0x1cc   :  { %1469 = vst.msk [vmem:[%s2692_s4 + $0x28] sm:$0xff] %vm1463_vm1, %v1436_v38  ;;  %v1435_v40 = vmax.f32 %v1403_v39, 0.0 }
 0x1cd   :  { %v1955_v41 = vpop.f32.mrf.mxu1 }
 0x1ce   :  { %1468 = vst.msk [vmem:[%s2692_s4 + $0x20] sm:$0xff] %vm1463_vm1, %v1435_v40  ;;  %v1269_v63 = vadd.f32 %v1955_v41, %v2425_v13 }
 0x1cf   :  { %v1263_v44 = vpop.f32.mrf.mxu1 }
 0x1d0   :  { %v1406_v6 = vadd.f32 %v2494_v17, %v1269_v63  ;;  %v1264_v45 = vadd.f32 %v1263_v44, %v2429_v20 }
 0x1d2   :  { %v1438_v46 = vmax.f32 %v1406_v6, 0.0  ;;  %v1405_v47 = vadd.f32 %v2494_v17, %v1264_v45 }
 0x1d4   :  { %1471 = vst.msk [vmem:[%s2692_s4 + $0x38] sm:$0xff] %vm1463_vm1, %v1438_v46  ;;  %v1437_v48 = vmax.f32 %v1405_v47, 0.0 }
 0x1d5   :  { %v1958_v50 = vpop.f32.mrf.mxu1 }
 0x1d6   :  { %1470 = vst.msk [vmem:[%s2692_s4 + $0x30] sm:$0xff] %vm1463_vm1, %v1437_v48  ;;  %v1279_v13 = vadd.f32 %v1958_v50, %v2433_v27 }
 0x1d7   :  { %v1273_v52 = vpop.f32.mrf.mxu1 }
 0x1d8   :  { %v1408_v20 = vadd.f32 %v2494_v17, %v1279_v13  ;;  %v1274_v53 = vadd.f32 %v1273_v52, %v2437_v34 }
 0x1da   :  { %v1440_v55 = vmax.f32 %v1408_v20, 0.0  ;;  %v1407_v58 = vadd.f32 %v2494_v17, %v1274_v53 }
 0x1dc   :  { %1473 = vst.msk [vmem:[%s2692_s4 + $0x48] sm:$0xff] %vm1463_vm1, %v1440_v55  ;;  %v1439_v16 = vmax.f32 %v1407_v58, 0.0 }
 0x1dd   :  { %v1961_v18 = vpop.f32.mrf.mxu1 }
 0x1de   :  { %1472 = vst.msk [vmem:[%s2692_s4 + $0x40] sm:$0xff] %vm1463_vm1, %v1439_v16  ;;  %v1289_v27 = vadd.f32 %v1961_v18, %v2441_v43 }
 0x1df   :  { %v1283_v19 = vpop.f32.mrf.mxu1 }
 0x1e0   :  { %v1410_v34 = vadd.f32 %v2494_v17, %v1289_v27  ;;  %v1284_v21 = vadd.f32 %v1283_v19, %v2445_v51 }
 0x1e2   :  { %v1442_v22 = vmax.f32 %v1410_v34, 0.0  ;;  %v1409_v23 = vadd.f32 %v2494_v17, %v1284_v21 }
 0x1e4   :  { %1475 = vst.msk [vmem:[%s2692_s4 + $0x58] sm:$0xff] %vm1463_vm1, %v1442_v22  ;;  %v1441_v24 = vmax.f32 %v1409_v23, 0.0 }
 0x1e5   :  { %v1964_v25 = vpop.f32.mrf.mxu1 }
 0x1e6   :  { %1474 = vst.msk [vmem:[%s2692_s4 + $0x50] sm:$0xff] %vm1463_vm1, %v1441_v24  ;;  %v1299_v43 = vadd.f32 %v1964_v25, %v2449_v54 }
 0x1e7   :  { %v1293_v26 = vpop.f32.mrf.mxu1 }
 0x1e8   :  { %v1412_v51 = vadd.f32 %v2494_v17, %v1299_v43  ;;  %v1294_v35 = vadd.f32 %v1293_v26, %v2452_v57 }
 0x1ea   :  { %v1444_v28 = vmax.f32 %v1412_v51, 0.0  ;;  %v1411_v42 = vadd.f32 %v2494_v17, %v1294_v35 }
 0x1ec   :  { %1477 = vst.msk [vmem:[%s2692_s4 + $0x68] sm:$0xff] %vm1463_vm1, %v1444_v28  ;;  %v1443_v29 = vmax.f32 %v1411_v42, 0.0 }
 0x1ed   :  { %v1967_v30 = vpop.f32.mrf.mxu1 }
 0x1ee   :  { %1476 = vst.msk [vmem:[%s2692_s4 + $0x60] sm:$0xff] %vm1463_vm1, %v1443_v29  ;;  %v1309_v54 = vadd.f32 %v1967_v30, %v2455_v59 }
 0x1ef   :  { %v1303_v31 = vpop.f32.mrf.mxu1 }
 0x1f0   :  { %v1414_v57 = vadd.f32 %v2494_v17, %v1309_v54  ;;  %v1304_v32 = vadd.f32 %v1303_v31, %v2457_v60 }
 0x1f2   :  { %v1446_v33 = vmax.f32 %v1414_v57, 0.0  ;;  %v1413_v49 = vadd.f32 %v2494_v17, %v1304_v32 }
 0x1f4   :  { %1479 = vst.msk [vmem:[%s2692_s4 + $0x78] sm:$0xff] %vm1463_vm1, %v1446_v33  ;;  %v1445_v36 = vmax.f32 %v1413_v49, 0.0 }
 0x1f5   :  { %v1970_v56 = vpop.f32.mrf.mxu1 }
 0x1f6   :  { %1478 = vst.msk [vmem:[%s2692_s4 + $0x70] sm:$0xff] %vm1463_vm1, %v1445_v36  ;;  %v1319_v59 = vadd.f32 %v1970_v56, %v2459_v61 }
 0x1f7   :  { %v1313_v37 = vpop.f32.mrf.mxu1 }
 0x1f8   :  { %v1416_v60 = vadd.f32 %v2494_v17, %v1319_v59  ;;  %v1314_v38 = vadd.f32 %v1313_v37, %v2461_v62 }
 0x1fa   :  { %v1448_v39 = vmax.f32 %v1416_v60, 0.0  ;;  %v1415_v40 = vadd.f32 %v2494_v17, %v1314_v38 }
 0x1fc   :  { %1481 = vst.msk [vmem:[%s2692_s4 + $0x88] sm:$0xff] %vm1463_vm1, %v1448_v39  ;;  %v1447_v41 = vmax.f32 %v1415_v40, 0.0 }
 0x1fd   :  { %v1973_v63 = vpop.f32.mrf.mxu1 }
 0x1fe   :  { %1480 = vst.msk [vmem:[%s2692_s4 + $0x80] sm:$0xff] %vm1463_vm1, %v1447_v41  ;;  %v1329_v61 = vadd.f32 %v1973_v63, %v2463_v0 }
 0x1ff   :  { %v1323_v44 = vpop.f32.mrf.mxu1 }
 0x200   :  { %v1418_v62 = vadd.f32 %v2494_v17, %v1329_v61  ;;  %v1324_v6 = vadd.f32 %v1323_v44, %v2465_v1 }
 0x202   :  { %v1450_v45 = vmax.f32 %v1418_v62, 0.0  ;;  %v1417_v46 = vadd.f32 %v2494_v17, %v1324_v6 }
 0x204   :  { %1483 = vst.msk [vmem:[%s2692_s4 + $0x98] sm:$0xff] %vm1463_vm1, %v1450_v45  ;;  %v1449_v47 = vmax.f32 %v1417_v46, 0.0 }
 0x205   :  { %v1976_v48 = vpop.f32.mrf.mxu1 }
 0x206   :  { %1482 = vst.msk [vmem:[%s2692_s4 + $0x90] sm:$0xff] %vm1463_vm1, %v1449_v47  ;;  %v1339_v0 = vadd.f32 %v1976_v48, %v2467_v2 }
 0x207   :  { %v1333_v50 = vpop.f32.mrf.mxu1 }
 0x208   :  { %v1420_v1 = vadd.f32 %v2494_v17, %v1339_v0  ;;  %v1334_v13 = vadd.f32 %v1333_v50, %v2469_v3 }
 0x20a   :  { %v1452_v52 = vmax.f32 %v1420_v1, 0.0  ;;  %v1419_v20 = vadd.f32 %v2494_v17, %v1334_v13 }
 0x20c   :  { %1485 = vst.msk [vmem:[%s2692_s4 + $0xa8] sm:$0xff] %vm1463_vm1, %v1452_v52  ;;  %v1451_v53 = vmax.f32 %v1419_v20, 0.0 }
 0x20d   :  { %v1979_v55 = vpop.f32.mrf.mxu1 }
 0x20e   :  { %1484 = vst.msk [vmem:[%s2692_s4 + $0xa0] sm:$0xff] %vm1463_vm1, %v1451_v53  ;;  %v1349_v2 = vadd.f32 %v1979_v55, %v2471_v4 }
 0x20f   :  { %v1343_v58 = vpop.f32.mrf.mxu1 }
 0x210   :  { %v1422_v3 = vadd.f32 %v2494_v17, %v1349_v2  ;;  %v1344_v16 = vadd.f32 %v1343_v58, %v2473_v5 }
 0x212   :  { %v1454_v18 = vmax.f32 %v1422_v3, 0.0  ;;  %v1421_v27 = vadd.f32 %v2494_v17, %v1344_v16 }
 0x214   :  { %1487 = vst.msk [vmem:[%s2692_s4 + $0xb8] sm:$0xff] %vm1463_vm1, %v1454_v18  ;;  %v1453_v19 = vmax.f32 %v1421_v27, 0.0 }
 0x215   :  { %v1982_v34 = vpop.f32.mrf.mxu1 }
 0x216   :  { %1486 = vst.msk [vmem:[%s2692_s4 + $0xb0] sm:$0xff] %vm1463_vm1, %v1453_v19  ;;  %v1359_v4 = vadd.f32 %v1982_v34, %v2475_v7 }
 0x217   :  { %v1353_v21 = vpop.f32.mrf.mxu1 }
 0x218   :  { %v1424_v5 = vadd.f32 %v2494_v17, %v1359_v4  ;;  %v1354_v22 = vadd.f32 %v1353_v21, %v2477_v8 }
 0x21a   :  { %v1456_v23 = vmax.f32 %v1424_v5, 0.0  ;;  %v1423_v24 = vadd.f32 %v2494_v17, %v1354_v22 }
 0x21c   :  { %1489 = vst.msk [vmem:[%s2692_s4 + $0xc8] sm:$0xff] %vm1463_vm1, %v1456_v23  ;;  %v1455_v25 = vmax.f32 %v1423_v24, 0.0 }
 0x21d   :  { %v1985_v43 = vpop.f32.mrf.mxu1 }
 0x21e   :  { %1488 = vst.msk [vmem:[%s2692_s4 + $0xc0] sm:$0xff] %vm1463_vm1, %v1455_v25  ;;  %v1369_v7 = vadd.f32 %v1985_v43, %v2479_v9 }
 0x21f   :  { %v1363_v26 = vpop.f32.mrf.mxu1 }
 0x220   :  { %v1426_v8 = vadd.f32 %v2494_v17, %v1369_v7  ;;  %v1364_v51 = vadd.f32 %v1363_v26, %v2481_v10 }
 0x222   :  { %v1458_v35 = vmax.f32 %v1426_v8, 0.0  ;;  %v1425_v28 = vadd.f32 %v2494_v17, %v1364_v51 }
 0x224   :  { %1491 = vst.msk [vmem:[%s2692_s4 + $0xd8] sm:$0xff] %vm1463_vm1, %v1458_v35  ;;  %v1457_v42 = vmax.f32 %v1425_v28, 0.0 }
 0x225   :  { %v1988_v29 = vpop.f32.mrf.mxu1 }
 0x226   :  { %1490 = vst.msk [vmem:[%s2692_s4 + $0xd0] sm:$0xff] %vm1463_vm1, %v1457_v42  ;;  %v1379_v9 = vadd.f32 %v1988_v29, %v2483_v11 }
 0x227   :  { %v1373_v30 = vpop.f32.mrf.mxu1 }
 0x228   :  { %v1428_v10 = vadd.f32 %v2494_v17, %v1379_v9  ;;  %v1374_v54 = vadd.f32 %v1373_v30, %v2485_v12 }
 0x22a   :  { %v1460_v31 = vmax.f32 %v1428_v10, 0.0  ;;  %v1427_v57 = vadd.f32 %v2494_v17, %v1374_v54 }
 0x22c   :  { %1493 = vst.msk [vmem:[%s2692_s4 + $0xe8] sm:$0xff] %vm1463_vm1, %v1460_v31  ;;  %v1459_v32 = vmax.f32 %v1427_v57, 0.0 }
 0x22d   :  { %v1991_v33 = vpop.f32.mrf.mxu1 }
 0x22e   :  { %1492 = vst.msk [vmem:[%s2692_s4 + $0xe0] sm:$0xff] %vm1463_vm1, %v1459_v32  ;;  %v1389_v11 = vadd.f32 %v1991_v33, %v2487_v14 }
 0x22f   :  { %v1383_v49 = vpop.f32.mrf.mxu1 }
 0x230   :  { %v1430_v12 = vadd.f32 %v2494_v17, %v1389_v11  ;;  %v1384_v36 = vadd.f32 %v1383_v49, %v2489_v15 }
 0x232   :  { %v1462_v56 = vmax.f32 %v1430_v12, 0.0  ;;  %v1429_v59 = vadd.f32 %v2494_v17, %v1384_v36 }
 0x234   :  { %1495 = vst.msk [vmem:[%s2692_s4 + $0xf8] sm:$0xff] %vm1463_vm1, %v1462_v56  ;;  %v1461_v37 = vmax.f32 %v1429_v59, 0.0 }
 0x236   :  { %1494 = vst.msk [vmem:[%s2692_s4 + $0xf0] sm:$0xff] %vm1463_vm1, %v1461_v37 }

</bundles_post_ra>
